<compile_context>
chip_gen: v7x
topology: tpu7x:2x2x1
jax: 0.10.0
libtpu: 0.0.40
codegen_flags: <defaults>
</compile_context>

<pallas_src>
import functools

import jax
import jax.numpy as jnp
from jax.experimental import pallas as pl
from jax.experimental.pallas import tpu as pltpu


def _round_up(x, m):
    return ((x + m - 1) // m) * m


def _default_vmem_limit_bytes():
    """Scoped VMEM limit ~2/3 of physical VMEM: ~42 MiB on v7x, ~85 MiB on v5e/v6e."""
    try:
        phys = int(pltpu.get_tpu_info().vmem_capacity_bytes)
    except Exception:
        phys = 64 * 1024 * 1024          # conservative: v7x per-TensorCore VMEM
    return int(max(32 * 1024 * 1024, min(phys * 2 // 3, 96 * 1024 * 1024)))


def _derive_block_rows(M, C, itemsize, vmem_limit_bytes):
    # Per-row VMEM footprint (bytes):
    #   input tile             : C * itemsize   x 2 (double-buffered)
    #   target tile (lane pad) : 128 * 4        x 2 (double-buffered)
    #   in-kernel temporaries  : ~4 x (TM, C) f32 (upcast, iota/onehot,
    #                            exp(x - m), weighted product)
    per_row = 2 * C * itemsize + 2 * 128 * 4 + 4 * C * 4
    budget = vmem_limit_bytes // 2                 # headroom for compiler scratch
    br_vmem = budget // max(per_row, 1)
    # HBM-roofline target: ~4 MiB per input buffer gets >=85% of peak bandwidth;
    # bigger tiles stop helping once the DMA is hidden (especially on v7x).
    br_bytes = (4 * 1024 * 1024) // max(C * itemsize, 1)
    br = min(br_vmem, br_bytes)
    # Guarantee >= ~8 grid steps so the pipeline overlaps prefetch/compute and
    # the "parallel" axis can be sharded across v7x's two TensorCores.
    br = min(br, _round_up(pl.cdiv(M, 8), 8))
    return int(max(8, (br // 8) * 8))              # sublane multiple, >= 8


def _label_smooth_kernel(x_ref, t_ref, o_ref, *, smoothing, input_type,
                         n_rows, block_rows, has_tail, bf16_exp):
    # x_ref: (TM, C) logits/probs; t_ref: (TM, 1) int32 sparse targets;
    # o_ref: (1, 8, 128) per-block partial sum broadcast over a full vreg.
    i = pl.program_id(0)
    x = x_ref[...].astype(jnp.float32)             # bf16 inputs upcast in-kernel
    t = t_ref[...]                                 # (TM, 1) int32
    TM, C = x.shape

    if has_tail:
        # Tail block: rows past n_rows hold unspecified bytes.  Sanitize them
        # right after the load so no cross-row op can ingest garbage, then mask
        # them out of the block sum below.
        row_idx = i * block_rows + jax.lax.broadcasted_iota(jnp.int32, (TM, 1), 0)
        valid = row_idx < n_rows
        x = jnp.where(valid, x, 0.0 if input_type == "logit" else 1.0)
        t = jnp.where(valid, t, 0)

    # one-hot(target) via lane-iota compare (replaces the PyTorch scatter_)
    lane = jax.lax.broadcasted_iota(jnp.int32, (TM, C), 1)
    onehot = lane == t                             # (TM, C) bool

    s = float(smoothing)
    u = s / max(C - 1.0, 1.0)                      # guard degenerate C == 1
    w = jnp.where(onehot, jnp.float32(1.0 - s), jnp.float32(u))   # (TM, C)

    if input_type == "logit":
        # loss_row = -sum_c w_c * (x_c - lse) = lse - sum_c w_c * x_c,
        # because sum_c w_c == 1.  Single weighted reduce; the separate sum_x
        # reduction and the large C*lse cancellation term are gone.
        m = jnp.max(x, axis=-1, keepdims=True)                     # (TM, 1)
        xm = x - m
        if bf16_exp:
            # v6e/v7x EUP runs bf16 exp ~2x faster; accumulate sumexp in f32.
            e = jnp.exp(xm.astype(jnp.bfloat16)).astype(jnp.float32)
        else:
            e = jnp.exp(xm)
        lse = m + jnp.log(jnp.sum(e, axis=-1, keepdims=True))      # (TM, 1)
        row_loss = lse - jnp.sum(w * x, axis=-1, keepdims=True)    # (TM, 1)
    else:
        # 'prob' input: loss_row = -sum_c w_c * log(p_c).
        # NOTE: log(0) -> -inf matches the PyTorch reference semantics.
        row_loss = -jnp.sum(w * jnp.log(x), axis=-1, keepdims=True)

    if has_tail:
        row_loss = jnp.where(valid, row_loss, 0.0)

    # One f32 partial sum per block, broadcast across a full (8, 128) vreg so
    # the output store is lane/sublane-dense (unmasked vst).
    o_ref[...] = jnp.broadcast_to(jnp.sum(row_loss), (1, 8, 128))


def label_smooth_loss(logits, target, *, smoothing=0.0,
                      input_type="logit", target_type="sparse",
                      block_rows=None, vmem_limit_bytes=None,
                      bf16_exp=False):
    """logits: (N, *, C); target: (N, *) int (sparse) or (N, *, C) (one-hot)."""
    assert input_type in {"logit", "prob"}
    assert target_type in {"sparse", "one-hot"}

    C = logits.shape[-1]
    x2d = logits.reshape(-1, C)        # dtype passes through (bf16 halves HBM reads)
    M = x2d.shape[0]

    if target_type == "sparse":
        t2d = target.reshape(-1, 1).astype(jnp.int32)
    else:
        # one-hot target: the module uses argmax(-1) as the scatter index
        t2d = jnp.argmax(target.reshape(-1, C), axis=-1).reshape(-1, 1)
        t2d = t2d.astype(jnp.int32)

    if vmem_limit_bytes is None:
        vmem_limit_bytes = _default_vmem_limit_bytes()
    if block_rows is None:
        block_rows = _derive_block_rows(M, C, jnp.dtype(x2d.dtype).itemsize,
                                        vmem_limit_bytes)

    num_blocks = int(pl.cdiv(M, block_rows))
    has_tail = (M % block_rows) != 0

    kernel = functools.partial(_label_smooth_kernel,
                               smoothing=float(smoothing),
                               input_type=input_type,
                               n_rows=M,
                               block_rows=block_rows,
                               has_tail=has_tail,
                               bf16_exp=bf16_exp)

    partial_sums = pl.pallas_call(
        kernel,
        out_shape=jax.ShapeDtypeStruct((num_blocks, 8, 128), jnp.float32),
        grid_spec=pltpu.PrefetchScalarGridSpec(
            num_scalar_prefetch=0,
            grid=(num_blocks,),
            in_specs=[
                pl.BlockSpec((block_rows, C), lambda i: (i, 0)),
                pl.BlockSpec((block_rows, 1), lambda i: (i, 0)),
            ],
            out_specs=pl.BlockSpec((1, 8, 128), lambda i: (i, 0, 0)),
        ),
        compiler_params=pltpu.CompilerParams(
            dimension_semantics=("parallel",),
            vmem_limit_bytes=int(vmem_limit_bytes)),
    )(x2d, t2d)

    # loss = (-weight * log_prob).sum(-1).mean()  -> mean over all M rows
    return jnp.sum(partial_sums[:, 0, 0]) / jnp.float32(M)


def _reference(x, target, smoothing, input_type="logit"):
    C = x.shape[-1]
    xf = x.astype(jnp.float32)
    if input_type == "logit":
        log_prob = jax.nn.log_softmax(xf, axis=-1)
    else:
        log_prob = jnp.log(xf)
    w = jnp.full(x.shape, smoothing / (C - 1.0), dtype=jnp.float32)
    onehot = jax.nn.one_hot(target, C, dtype=jnp.float32)
    w = jnp.where(onehot > 0, 1.0 - smoothing, w)
    return jnp.mean(jnp.sum(-w * log_prob, axis=-1))


if __name__ == "__main__":
    key = jax.random.PRNGKey(0)
    k1, k2, k3, k4 = jax.random.split(key, 4)
    smoothing = 0.1

    # Case 1: (N, S, C) = (2, 8, 32) -> M = 16 rows (logit / sparse);
    # block_rows=8 -> 2-step grid exercises the multi-block parallel path.
    N, S, C = 2, 8, 32
    x = jax.random.normal(k1, (N, S, C), dtype=jnp.float32)
    t = jax.random.randint(k2, (N, S), 0, C, dtype=jnp.int32)
    loss = jax.block_until_ready(
        label_smooth_loss(x, t, smoothing=smoothing,
                          input_type="logit", target_type="sparse"))
    ref = _reference(x, t, smoothing, "logit")
    assert jnp.allclose(loss, ref, rtol=1e-5, atol=1e-5), (loss, ref)

    # Case 2: M = 15 (not a multiple of 8) exercises the cdiv grid + tail mask.
    N2, S2 = 3, 5
    x2 = jax.random.normal(k3, (N2, S2, C), dtype=jnp.float32)
    t2 = jax.random.randint(k4, (N2, S2), 0, C, dtype=jnp.int32)
    loss2 = jax.block_until_ready(
        label_smooth_loss(x2, t2, smoothing=smoothing,
                          input_type="logit", target_type="sparse"))
    ref2 = _reference(x2, t2, smoothing, "logit")
    assert jnp.allclose(loss2, ref2, rtol=1e-5, atol=1e-5), (loss2, ref2)

    # Case 3: 'prob' input + one-hot target path.
    p = jax.nn.softmax(x2, axis=-1)
    t_oh = jax.nn.one_hot(t2, C, dtype=jnp.float32)
    loss3 = jax.block_until_ready(
        label_smooth_loss(p, t_oh, smoothing=smoothing,
                          input_type="prob", target_type="one-hot"))
    ref3 = _reference(p, t2, smoothing, "prob")
    assert jnp.allclose(loss3, ref3, rtol=1e-5, atol=1e-5), (loss3, ref3)

    print("KERNEL_OK")
</pallas_src>

<mosaic_0001>
module attributes {stable_mosaic.version = 11 : i64} {
  func.func @_label_smooth_kernel(%arg0: i32, %arg1: memref<8x32xf32, #tpu.memory_space<vmem>>, %arg2: memref<8x1xi32, #tpu.memory_space<vmem>>, %arg3: memref<1x8x128xf32, #tpu.memory_space<vmem>>) attributes {dimension_semantics = [#tpu.dimension_semantics<parallel>], iteration_bounds = array<i64: 2>, scalar_prefetch = 0 : i64, scratch_operands = 0 : i64, tpu.core_type = #tpu.core_type<tc>, window_params = [{transform_indices = @transform_0, window_bounds = array<i64: 8, 32>}, {transform_indices = @transform_1, window_bounds = array<i64: 8, 1>}, {transform_indices = @transform_2, window_bounds = array<i64: 1, 8, 128>}]} {
    %c0 = arith.constant 0 : index
    %c0_0 = arith.constant 0 : index
    %0 = vector.load %arg1[%c0, %c0_0] : memref<8x32xf32, #tpu.memory_space<vmem>>, vector<8x32xf32>
    %c0_1 = arith.constant 0 : index
    %c0_2 = arith.constant 0 : index
    %1 = vector.load %arg2[%c0_1, %c0_2] : memref<8x1xi32, #tpu.memory_space<vmem>>, vector<8x1xi32>
    %2 = tpu.iota {dimensions = array<i32: 1>} : vector<8x32xi32>
    %3 = vector.broadcast %1 : vector<8x1xi32> to vector<8x32xi32>
    %4 = arith.cmpi eq, %2, %3 : vector<8x32xi32>
    %cst = arith.constant 0.899999976 : f32
    %cst_3 = arith.constant 0.0032258064 : f32
    %5 = vector.broadcast %cst : f32 to vector<8x32xf32>
    %6 = vector.broadcast %cst_3 : f32 to vector<8x32xf32>
    %7 = arith.select %4, %5, %6 : vector<8x32xi1>, vector<8x32xf32>
    %cst_4 = arith.constant dense<0xFF800000> : vector<8xf32>
    %8 = vector.multi_reduction <maximumf>, %0, %cst_4 [1] : vector<8x32xf32> to vector<8xf32>
    %9 = vector.shape_cast %8 : vector<8xf32> to vector<8x1xf32>
    %10 = vector.broadcast %9 : vector<8x1xf32> to vector<8x32xf32>
    %11 = arith.subf %0, %10 : vector<8x32xf32>
    %12 = math.exp %11 : vector<8x32xf32>
    %cst_5 = arith.constant dense<0.000000e+00> : vector<8xf32>
    %13 = vector.multi_reduction <add>, %12, %cst_5 [1] : vector<8x32xf32> to vector<8xf32>
    %14 = vector.shape_cast %13 : vector<8xf32> to vector<8x1xf32>
    %15 = math.log %14 : vector<8x1xf32>
    %16 = arith.addf %9, %15 : vector<8x1xf32>
    %17 = arith.mulf %7, %0 : vector<8x32xf32>
    %cst_6 = arith.constant dense<0.000000e+00> : vector<8xf32>
    %18 = vector.multi_reduction <add>, %17, %cst_6 [1] : vector<8x32xf32> to vector<8xf32>
    %19 = vector.shape_cast %18 : vector<8xf32> to vector<8x1xf32>
    %20 = arith.subf %16, %19 : vector<8x1xf32>
    %21 = vector.shape_cast %20 : vector<8x1xf32> to vector<1x8x1xf32>
    %cst_7 = arith.constant dense<0.000000e+00> : vector<1xf32>
    %22 = vector.multi_reduction <add>, %21, %cst_7 [1, 2] : vector<1x8x1xf32> to vector<1xf32>
    %23 = vector.shape_cast %22 : vector<1xf32> to vector<1x1x1xf32>
    %24 = vector.extract %23[0, 0, 0] : f32 from vector<1x1x1xf32>
    %25 = vector.broadcast %24 : f32 to vector<1x8x128xf32>
    %c0_8 = arith.constant 0 : index
    %c0_9 = arith.constant 0 : index
    %c0_10 = arith.constant 0 : index
    %26 = vector.load %arg3[%c0_8, %c0_9, %c0_10] : memref<1x8x128xf32, #tpu.memory_space<vmem>>, vector<1x8x128xf32>
    tpu.vector_store %arg3[%c0_8, %c0_9, %c0_10], %25 {strides = array<i32>} : memref<1x8x128xf32, #tpu.memory_space<vmem>>, vector<1x8x128xf32>,
    return
  }
  func.func @transform_0(%arg0: i32) -> (i32, i32) {
    %c0_i32 = arith.constant 0 : i32
    %c0_i32_0 = arith.constant 0 : i32
    return %arg0, %c0_i32 : i32, i32
  }
  func.func @transform_1(%arg0: i32) -> (i32, i32) {
    %c0_i32 = arith.constant 0 : i32
    %c0_i32_0 = arith.constant 0 : i32
    return %arg0, %c0_i32 : i32, i32
  }
  func.func @transform_2(%arg0: i32) -> (i32, i32, i32) {
    %c0_i32 = arith.constant 0 : i32
    %c0_i32_0 = arith.constant 0 : i32
    %c0_i32_1 = arith.constant 0 : i32
    return %arg0, %c0_i32, %c0_i32_0 : i32, i32, i32
  }
}

</mosaic_0001>

<bundles_post_ra>
// kernel: tpu_custom_call.1
= control target key start
LH: loop header
LB: loop body
LE: loop exit
PB: predicated region body
PF: predicated region fallthrough
CT: control target
= control target key end

     0   :  { %7 = vsyncpa [#allocation3], 0  ;;  %s528_s0 = inlined_call_operand.vmem [shape: f32[16,32], index: 0, kind: input, shape index: {}]   ;;  %s529_s1 = inlined_call_operand.vmem [shape: s32[16,1], index: 1, kind: input, shape index: {}]   ;;  %s530_s2 = inlined_call_operand.hbm [shape: f32[2,8,128], index: 2, kind: output, shape index: {}]  }
   0x1   :  { %9 = vsyncpa [#allocation3 + $0x1], 0  ;;  %s422_s9 = smov 0   ;;  %s424_s10 = smov 0  }
   0x2   :  { %s426_s11 = smov 0   ;;  %s428_s12 = smov 0  }
   0x3 LB: > { %s443_s13 = sadd.s32 4294967295, %s402_s12   ;;  %s281_s14 = sadd.s32 4294967294, %s402_s12   ;;  %s402_s12 = sphi %s428_s12, %s536_s12   ;;  %s398_s11 = sphi %s426_s11, %s535_s11   ;;  %s394_s10 = sphi %s424_s10, %s534_s10   ;;  %s390_s9 = sphi %s422_s9, %s533_s9  }
   0x4   : > { %s447_s15 = sadd.s32 1, %s402_s12   ;;  %s74_s16 = sadd.s32 1, %s398_s11 }
   0x5   : > { %s71_s17 = ssub.s32 %s402_s12, %s447_s15  ;;  %p84_p0 = scmp.ne.s32.totalorder %s398_s11, %s394_s10 }
   0x6   : > { %p72_p1 = scmp.eq.s32.totalorder %s71_s17, 0  ;;  %p85_p2 = scmp.eq.s32.totalorder %s443_s13, 1 }
   0x7   : > { %p90_p3 = scmp.ne.s32.totalorder %s394_s10, %s390_s9  ;;  %p91_p4 = scmp.eq.s32.totalorder %s281_s14, 1 }
   0x8   : > { %s458_s18 = scalar_select %p72_p1, %s398_s11, %s74_s16  }
   0x9   : > { %p460_p5 = por %p85_p2, %p84_p0  ;;  %p464_p6 = por %p91_p4, %p90_p3 }
   0xa   : > { %p284_p7 = scmp.ge.s32.totalorder %s402_s12, 1  ;;  %p123_p8 = scmp.lt.s32.totalorder %s402_s12, 3 }
   0xc   : > { %p124_p9 = pnand %p284_p7, %p123_p8 }
   0xd   : > { %p148_p10 = scmp.lt.s32.totalorder (!%p124_p9), %s443_s13, 1  ;;  %v404_v0 = vmov (!%p124_p9), 0   ;;  %vm165_vm0 = vcmask (!%p124_p9), 261120   ;;  %v158_v6 = vlaneseq (!%p124_p9)  ;;  %v405_v10 = vmov (!%p124_p9), 0.0032258064   ;;  %s145_s29 = sand.u32 (!%p124_p9), 1, %s394_s10  }
   0xe   : > { %127 = sbr.rel (%p124_p9) target bundleno = 564 (0x234), region = 28  ;;  %335 = vset.pattern.permute.xlu0 (!%p124_p9), %v404_v0  ;;  %vm183_vm2 = vcmask (!%p124_p9), 7168   ;;  %s285_s30 = sshll.u32 (!%p124_p9), %s145_s29, 3 }
   0xf   : > { %v159_v8 = vand.u32 (!%p124_p9), 127, %v158_v6  ;;  %s147_s3 = scalar_lea.vmem (!%p124_p9), [#allocation2], %s285_s30  ;;  %s289_s5 = sshll.u32 (!%p124_p9), %s443_s13, 7 }
  0x10   : > { %s210_s4 = sshll.u32 (!%p124_p9), %s147_s3, 4  ;;  %s488_s14 = scalar_lea.hbm (!%p124_p9), %s530_s2, %s289_s5  ;;  %s483_s4 = int_to_ptr.vmem [resolvable:$true] %s210_s4 }
  0x11   : > { %s197_s16 = scalar_lea.sflag (!%p124_p9), [#allocation3], %s145_s29  ;;  %s340_s17 = scalar_lea.vmem (!%p124_p9), %s483_s4, 128 }
  0x12   : > { %p341_p11 = scmp.ne.s32.totalorder (!%p124_p9), %s483_s4, %s340_s17 }
  0x14   : > { %p342_p12 = pnand (!%p124_p9), %p341_p11, %p460_p5 }
  0x15   : > { %s149_s21 = scalar_select %p148_p10, %s443_s13, 1 }
  0x16   : > { %p343_p13 = pneg %p342_p12  ;;  %s406_s13 = smov [#allocation2]  }
  0x17   : > { %s286_s22 = sshll.u32 %s149_s21, 3  ;;  %s344_s21 = sshll.u32 %s406_s13, 4  ;;  %s345_s21 = int_to_ptr.vmem [resolvable:$false] %s344_s21 }
  0x18   : > { %s151_s25 = scalar_lea.vmem %s528_s0, %s286_s22  ;;  %s155_s28 = scalar_lea.vmem %s529_s1, %s286_s22 }
  0x19   : > { %v156_v1 = vld [vmem:[%s151_s25] sm:$0xff]  ;;  %s346_s22 = scalar_lea.vmem %s345_s21, 256  ;;  %p347_p0 = scmp.lt.s32.totalorder %s483_s4, %s345_s21 }
  0x1a   : > { %v166_v2 = vsel %vm165_vm0, %v156_v1, -inf  ;;  %v157_v3 = vld [vmem:[%s155_s28] sm:$0xff]  ;;  %p348_p1 = scmp.lt.s32.totalorder %s346_s22, %s340_s17 }
  0x1b   : > { %167 = vmax.xlane.f32.xlu0 %v166_v2 }
  0x1c   : > { %p349_p2 = por %p348_p1, %p347_p0 }
  0x1e   : > { %p350_p3 = pnand %p349_p2, %p343_p13 }
  0x31   : > { %161 = vperm.xlu0 %335, %v157_v3  }
  0xa8   : > { %v168_v4 = vpop.xlane.xlu0 %167 }
  0xa9   : > { %v169_v5 = vsub.f32 %v156_v1, %v168_v4 }
  0xab   : > { %v170_v7 = vmul.f32 1.442695, %v169_v5 }
  0xad   : > { %336 = vpow2.f32 %v170_v7 }
  0xb0   : > { %v162_v9 = vpop.permute.xlu0 %161 }
  0xb1   : > { %vm163_vm1 = vcmp.eq.s32.totalorder %v159_v8, %v162_v9 }
  0xb2   : > { %v164_v11 = vsel %vm163_vm1, 0.9, %v405_v10 }
  0xb3   : > { %v178_v12 = vmul.f32 %v164_v11, %v156_v1 }
  0xb5   : > { %v179_v15 = vsel %vm165_vm0, %v178_v12, 0.0 }
  0xb7   : > { %v337_v13 = vpop.eup %336 }
  0xb8   : > { %v172_v14 = vsel %vm165_vm0, %v337_v13, 0.0 }
  0xb9   : > { %173 = vadd.xlane.f32.xlu1 %v172_v14 }
  0xbd   : > { %180 = vadd.xlane.f32.xlu1 %v179_v15 }
 0x146   : > { %v174_v16 = vpop.xlane.xlu1 %173 }
 0x147   : > { %338 = vlog2.f32 %v174_v16 }
 0x14a   : > { %v181_v19 = vpop.xlane.xlu1 %180 }
 0x151   : > { %v339_v17 = vpop.eup %338 }
 0x152   : > { %v176_v18 = vmul.f32 0.6931472, %v339_v17 }
 0x154   : > { %v177_v20 = vadd.f32 %v176_v18, %v168_v4 }
 0x156   : > { %v182_v21 = vsub.f32 %v177_v20, %v181_v19 }
 0x158   : > { %v184_v22 = vsel %vm183_vm2, %v182_v21, 0.0 }
 0x159   : > { %185 = vadd.xlane.f32.xlu1 %v184_v22 }
 0x1e6   : > { %v186_v23 = vpop.xlane.xlu1 %185 }
 0x1e7   : > { %v187_v24 = vrot.slane %v186_v23, 4 }
 0x1e9   : > { %v188_v25 = vadd.f32 %v187_v24, %v186_v23 }
 0x1eb   : > { %v189_v26 = vrot.slane %v188_v25, 2 }
 0x1ed   : > { %v190_v27 = vadd.f32 %v189_v26, %v188_v25 }
 0x1ef   : > { %v191_v28 = vrot.slane %v190_v27, 1 }
 0x1f1   : > { %v192_v29 = vadd.f32 %v191_v28, %v190_v27 }
 0x1f3   : > { %292 = vpush %v192_v29 }
 0x224   : > { %s293_s6 = spop %292 }
 0x225   : > { %v194_v30 = vstv %s293_s6 }
 0x226   : > { %195 = vst [vmem:[%s147_s3] sm:$0xff] %v194_v30 }
 0x227   : > { %353 = shalt.err (!%p350_p3)
}
 0x228   : > { %s354_s23 = scalar_lea.hbm %s488_s14, 128  ;;  %s358_s26 = scalar_lea.hbm %s530_s2, 256 }
 0x229   : > { %p355_p4 = scmp.ne.s32.totalorder %s488_s14, %s354_s23  ;;  %p359_p9 = scmp.lt.u32.totalorder %s488_s14, %s530_s2 }
 0x22a   : > { %p360_p10 = scmp.lt.u32.totalorder %s358_s26, %s354_s23  ;;  %p362_p12 = scmp.lt.u32.totalorder %s354_s23, %s488_s14 }
 0x22b   : > { %p356_p7 = pnand %p355_p4, %p460_p5 }
 0x22c   : > { %p361_p11 = por %p360_p10, %p359_p9 }
 0x22d   : > { %p357_p8 = pneg %p356_p7 }
 0x22e   : > { %p363_p13 = por %p362_p12, %p361_p11 }
 0x230   : > { %p364_p0 = pnand %p363_p13, %p357_p8 }
 0x232   : > { %367 = shalt.err (!%p364_p0)
}
 0x233   : > { %294 = dma.vmem_to_hbm [thread:$0]  (%p460_p5), %s483_s4, 128, %s488_s14, %s197_s16  }
 0x234 PF: > { %p300_p1 = scmp.ge.s32.totalorder %s402_s12, 2  ;;  %s222_s29 = sand.u32 1, %s390_s9  }
 0x235   : > { %s223_s30 = scalar_lea.sflag [#allocation3], %s222_s29 }
 0x236   : > { %p297_p2 = pnand %p300_p1, %p464_p6 }
 0x238   : > { %385 = dma.done.wait (!%p297_p2), %s223_s30, 128  }
 0x239   : > { %387 = vsyncadd (!%p297_p2), %s223_s30, 4294967168  ;;  %p12_p3 = scmp.ge.s32.totalorder %s447_s15, 4   ;;  %s533_s9 = smov %s394_s10 }
 0x23a   : > { %s534_s10 = smov %s398_s11  ;;  %s535_s11 = smov %s458_s18 }
 0x23b   : > { %s536_s12 = smov %s447_s15  ;;  %14 = sbr.rel (!%p12_p3) target bundleno = 3 (0x3), region = 66 }
 0x242   :  { %228 = vsyncpa [#allocation3], 1 }
 0x243   :  { %230 = vsyncpa [#allocation3 + $0x1], 1 }

</bundles_post_ra>
